<compile_context>
chip_gen: v5e
topology: v5e:2x2
jax: 0.10.0
libtpu: 0.0.40
codegen_flags: <defaults>
</compile_context>

<pallas_src>
import jax
import jax.numpy as jnp
from jax.experimental import pallas as pl
from jax.experimental.pallas import tpu as pltpu

EPS = 1e-5


# ----------------------------------------------------------------------------
# Fused kernel: gcn (A-first) + BN1 + ReLU + temporal conv + BN2 + residual + ReLU
# ----------------------------------------------------------------------------
def _make_kernel(K, KT, V, pad, t_tile):
    TVt = t_tile * V

    def kernel(xt_ref, abd_ref, w1_ref, wtr_ref, sh1_ref, shout_ref, o_ref):
        # xt_ref   : (Cin, TVp) bf16      haloed x tile, TVp = (t_tile+2*pad)*V
        # abd_ref  : (K, TVp, TVp) bf16   block-diagonal adjacency kron(I, A[k])
        # w1_ref   : (Cout, K*Cin) bf16   gcn 1x1 conv, A-first packing, BN1 scale folded
        # wtr_ref  : (Cout, KT*Cout+Cin) bf16  temporal taps + residual 1x1, BN folded
        # sh1_ref  : (Cout, TVp) f32      BN1 shift + gcn bias pushed through A
        # shout_ref: (Cout, 1) f32        tcn bias*s2 + BN2 shift + res bias*sr + BNr shift
        # o_ref    : (Cout, TVt) f32
        TVp = xt_ref.shape[1]
        f32, bf16 = jnp.float32, jnp.bfloat16

        x = xt_ref[...]                                              # (Cin, TVp) bf16

        # ---- gcn, "A first": K block-diagonal spatial aggregations stay in the
        # lane-dense (C, T*V) layout, then one K*Cin-deep channel matmul.
        xs = jnp.concatenate(
            [jnp.dot(x, abd_ref[k], preferred_element_type=f32) for k in range(K)],
            axis=0).astype(bf16)                                     # (K*Cin, TVp)
        h = jnp.dot(w1_ref[...], xs, preferred_element_type=f32) + sh1_ref[...]
        h = jnp.maximum(h, 0.0)                                      # BN1 + ReLU

        # ---- zero h where the halo corresponds to the tcn's *global* zero
        # padding (first / last time tile only). g = global padded column index.
        lane = jax.lax.broadcasted_iota(jnp.int32, (1, TVp), 1)
        g = pl.program_id(1) * TVt + lane
        keep = jnp.logical_and(g >= pad * V,
                               g < pad * V + pl.num_programs(1) * TVt)
        h = jnp.where(keep, h, 0.0)

        # ---- tcn + residual fused into ONE matmul: stack the KT temporal taps
        # of h and the (center) raw-x rows along the contraction dimension.
        taps = [h[:, dt * V: dt * V + TVt].astype(bf16) for dt in range(KT)]
        taps.append(x[:, pad * V: pad * V + TVt])                    # residual path
        hstack = jnp.concatenate(taps, axis=0)                       # (KT*Cout+Cin, TVt)
        out = jnp.dot(wtr_ref[...], hstack, preferred_element_type=f32)
        o_ref[...] = jnp.maximum(out + shout_ref[...], 0.0)

    return kernel


# ----------------------------------------------------------------------------
# Wrapper: fold BN into weights/shifts, build haloed time tiles, one pallas_call
# ----------------------------------------------------------------------------
def _fold_bn(gamma, beta, mean, var):
    scale = gamma / jnp.sqrt(var + EPS)
    shift = beta - mean * scale
    return scale, shift


def _choose_t_tile(T, V):
    # Smallest divisor of T giving a lane-dense (multiple of 128 lanes) output
    # tile; falls back to full T (still correct, just masked stores).
    for tt in range(1, T + 1):
        if T % tt == 0 and (tt * V) % 128 == 0:
            return tt
    return T


def st_gcn_forward(x_nchw, A, p, t_tile=None):
    N, Cin, T, V = x_nchw.shape
    K = A.shape[0]
    Cout = p["w1"].shape[1] // K
    KT = p["wt"].shape[0]
    pad = (KT - 1) // 2
    f32, bf16 = jnp.float32, jnp.bfloat16

    if t_tile is None:
        t_tile = _choose_t_tile(T, V)
    assert T % t_tile == 0
    n_tiles = T // t_tile
    Tp = t_tile + 2 * pad
    TVp = Tp * V
    TVt = t_tile * V

    # ---- overlapping (haloed) input time tiles: (N, n_tiles, Cin, TVp) bf16.
    xp = jnp.pad(x_nchw.astype(f32), ((0, 0), (0, 0), (pad, pad), (0, 0)))
    xt = jnp.stack([xp[:, :, i * t_tile: i * t_tile + Tp, :] for i in range(n_tiles)],
                   axis=1).reshape(N, n_tiles, Cin, TVp).astype(bf16)

    # ---- block-diagonal adjacency keeps the A contraction lane-dense.
    A_f32 = A.astype(f32)
    A_bd = jnp.einsum("tu,kvw->ktvuw", jnp.eye(Tp, dtype=f32), A_f32)
    A_bd = A_bd.reshape(K, TVp, TVp).astype(bf16)

    # ---- fold BatchNorms (eval) into matmul weights / per-channel shifts.
    s1, sh1 = _fold_bn(p["g1"], p["be1"], p["m1"], p["v1"])
    s2, sh2 = _fold_bn(p["g2"], p["be2"], p["m2"], p["v2"])
    sr, shr = _fold_bn(p["gr"], p["ber"], p["mr"], p["vr"])

    # gcn weight, A-first packing: w1p[c, k*Cin + i] = w1[i, k*Cout + c] * s1[c]
    w1p = (jnp.transpose(p["w1"].reshape(Cin, K, Cout), (2, 1, 0))
           .reshape(Cout, K * Cin) * s1[:, None]).astype(bf16)
    # gcn bias pushed through A (depends on graph node) + BN1 shift, tiled over T_tile+2*pad
    b1_kc = p["b1"].reshape(K, Cout) * s1[None, :]                   # (K, Cout)
    shift1 = jnp.einsum("kc,kw->cw", b1_kc, A_f32.sum(axis=1)) + sh1[:, None]
    shift1 = jnp.tile(shift1, (1, Tp)).astype(f32)                   # (Cout, TVp)

    # temporal taps + residual 1x1 packed along one contraction dim.
    wt_p = jnp.transpose(p["wt"], (2, 0, 1)).reshape(Cout, KT * Cout) * s2[:, None]
    wr_p = p["wr"].T * sr[:, None]                                   # (Cout, Cin)
    wtr = jnp.concatenate([wt_p, wr_p], axis=1).astype(bf16)         # (Cout, KT*Cout+Cin)
    shout = (p["bt"] * s2 + sh2 + p["br"] * sr + shr).reshape(Cout, 1).astype(f32)

    kernel = _make_kernel(K, KT, V, pad, t_tile)

    # per-step working set (double-buffered) + headroom; keeps v7x (64 MiB) safe.
    block_bytes = (Cin * TVp * 2 + K * TVp * TVp * 2 + Cout * K * Cin * 2
                   + Cout * (KT * Cout + Cin) * 2 + Cout * TVp * 4 + Cout * 4
                   + Cout * TVt * 4)
    vmem_limit = int(min(48 * 1024 * 1024, max(8 * 1024 * 1024, 4 * block_bytes)))

    out_flat = pl.pallas_call(
        kernel,
        out_shape=jax.ShapeDtypeStruct((N, Cout, T * V), f32),
        grid_spec=pltpu.PrefetchScalarGridSpec(
            num_scalar_prefetch=0,
            grid=(N, n_tiles),
            in_specs=[
                pl.BlockSpec((None, None, Cin, TVp), lambda n, t: (n, t, 0, 0)),
                pl.BlockSpec((K, TVp, TVp), lambda n, t: (0, 0, 0)),
                pl.BlockSpec((Cout, K * Cin), lambda n, t: (0, 0)),
                pl.BlockSpec((Cout, KT * Cout + Cin), lambda n, t: (0, 0)),
                pl.BlockSpec((Cout, TVp), lambda n, t: (0, 0)),
                pl.BlockSpec((Cout, 1), lambda n, t: (0, 0)),
            ],
            out_specs=pl.BlockSpec((None, Cout, TVt), lambda n, t: (n, 0, t)),
        ),
        compiler_params=pltpu.CompilerParams(
            dimension_semantics=("parallel", "parallel"),
            vmem_limit_bytes=vmem_limit,
        ),
    )(xt, A_bd, w1p, wtr, shift1, shout)

    return out_flat.reshape(N, Cout, T, V), A


# ----------------------------------------------------------------------------
# Pure-JAX f32 reference (mirrors the PyTorch NCHW forward, eval mode)
# ----------------------------------------------------------------------------
def reference(x, A, p):
    N, Cin, T, V = x.shape
    K = A.shape[0]
    Cout = p["w1"].shape[1] // K
    KT = p["wt"].shape[0]
    pad = (KT - 1) // 2

    y = jnp.einsum("nctv,co->notv", x, p["w1"]) + p["b1"][None, :, None, None]
    y = y.reshape(N, K, Cout, T, V)
    g = jnp.einsum("nkctv,kvw->nctw", y, A)

    s1 = p["g1"] / jnp.sqrt(p["v1"] + EPS); sh1 = p["be1"] - p["m1"] * s1
    h = jnp.maximum(g * s1[None, :, None, None] + sh1[None, :, None, None], 0.0)

    hp = jnp.pad(h, ((0, 0), (0, 0), (pad, pad), (0, 0)))
    out = p["bt"][None, :, None, None] + sum(
        jnp.einsum("nitv,io->notv", hp[:, :, dt:dt + T, :], p["wt"][dt])
        for dt in range(KT))
    s2 = p["g2"] / jnp.sqrt(p["v2"] + EPS); sh2 = p["be2"] - p["m2"] * s2
    out = out * s2[None, :, None, None] + sh2[None, :, None, None]

    res = jnp.einsum("nctv,co->notv", x, p["wr"]) + p["br"][None, :, None, None]
    sr = p["gr"] / jnp.sqrt(p["vr"] + EPS); shr = p["ber"] - p["mr"] * sr
    res = res * sr[None, :, None, None] + shr[None, :, None, None]

    return jnp.maximum(out + res, 0.0)


# ----------------------------------------------------------------------------
if __name__ == "__main__":
    # small shapes: N=2, Cin=4, Cout=8, T=16 timesteps, V=16 graph nodes,
    # kernel_size = (kt=3 temporal, K=3 spatial), stride=1, dropout=0 (eval)
    N, Cin, Cout, T, V, K, KT = 2, 4, 8, 16, 16, 3, 3

    key = jax.random.PRNGKey(0)
    ks = jax.random.split(key, 20)
    f32 = jnp.float32

    params = {
        # gcn 1x1 conv (Cin -> K*Cout), column index = k*Cout + c
        "w1": 0.1 * jax.random.normal(ks[0], (Cin, K * Cout), f32),
        "b1": 0.1 * jax.random.normal(ks[1], (K * Cout,), f32),
        # BN1 (eval): gamma, beta, running_mean, running_var
        "g1": jax.random.uniform(ks[2], (Cout,), f32, 0.5, 1.5),
        "be1": 0.1 * jax.random.normal(ks[3], (Cout,), f32),
        "m1": 0.1 * jax.random.normal(ks[4], (Cout,), f32),
        "v1": jax.random.uniform(ks[5], (Cout,), f32, 0.5, 1.5),
        # temporal conv (kt,1): wt[dt, ci, co]
        "wt": 0.1 * jax.random.normal(ks[6], (KT, Cout, Cout), f32),
        "bt": 0.1 * jax.random.normal(ks[7], (Cout,), f32),
        # BN2
        "g2": jax.random.uniform(ks[8], (Cout,), f32, 0.5, 1.5),
        "be2": 0.1 * jax.random.normal(ks[9], (Cout,), f32),
        "m2": 0.1 * jax.random.normal(ks[10], (Cout,), f32),
        "v2": jax.random.uniform(ks[11], (Cout,), f32, 0.5, 1.5),
        # residual 1x1 conv + BN (Cin != Cout, stride == 1)
        "wr": 0.1 * jax.random.normal(ks[12], (Cin, Cout), f32),
        "br": 0.1 * jax.random.normal(ks[13], (Cout,), f32),
        "gr": jax.random.uniform(ks[14], (Cout,), f32, 0.5, 1.5),
        "ber": 0.1 * jax.random.normal(ks[15], (Cout,), f32),
        "mr": 0.1 * jax.random.normal(ks[16], (Cout,), f32),
        "vr": jax.random.uniform(ks[17], (Cout,), f32, 0.5, 1.5),
    }

    x = jax.random.normal(ks[18], (N, Cin, T, V), f32)           # (N, C, T, V) NCHW
    A = jax.random.uniform(ks[19], (K, V, V), f32) / V           # (K, V, V)

    out, A_out = jax.jit(st_gcn_forward)(x, A, params)
    out = jax.block_until_ready(out)

    ref = reference(x, A, params)
    assert out.shape == (N, Cout, T, V)
    assert A_out.shape == (K, V, V)
    # bf16 MXU operands vs f32 reference -> relaxed (but bug-catching) tolerance.
    assert jnp.allclose(out, ref, rtol=3e-2, atol=3e-2), (
        float(jnp.max(jnp.abs(out - ref))))

    print("KERNEL_OK")
</pallas_src>

<mosaic_0001>
module attributes {stable_mosaic.version = 11 : i64} {
  func.func @kernel(%arg0: i32, %arg1: i32, %arg2: memref<1x1x4x160xbf16, #tpu.memory_space<vmem>>, %arg3: memref<3x160x160xbf16, #tpu.memory_space<vmem>>, %arg4: memref<8x12xbf16, #tpu.memory_space<vmem>>, %arg5: memref<8x28xbf16, #tpu.memory_space<vmem>>, %arg6: memref<8x160xf32, #tpu.memory_space<vmem>>, %arg7: memref<8x1xf32, #tpu.memory_space<vmem>>, %arg8: memref<1x8x128xf32, #tpu.memory_space<vmem>>) attributes {dimension_semantics = [#tpu.dimension_semantics<parallel>, #tpu.dimension_semantics<parallel>], iteration_bounds = array<i64: 2, 2>, scalar_prefetch = 0 : i64, scratch_operands = 0 : i64, tpu.core_type = #tpu.core_type<tc>, window_params = [{transform_indices = @transform_0, window_bounds = array<i64: 1, 1, 4, 160>}, {pipeline_mode = #tpu.pipeline_mode<synchronous>, transform_indices = @transform_1, window_bounds = array<i64: 3, 160, 160>}, {pipeline_mode = #tpu.pipeline_mode<synchronous>, transform_indices = @transform_2, window_bounds = array<i64: 8, 12>}, {pipeline_mode = #tpu.pipeline_mode<synchronous>, transform_indices = @transform_3, window_bounds = array<i64: 8, 28>}, {pipeline_mode = #tpu.pipeline_mode<synchronous>, transform_indices = @transform_4, window_bounds = array<i64: 8, 160>}, {pipeline_mode = #tpu.pipeline_mode<synchronous>, transform_indices = @transform_5, window_bounds = array<i64: 8, 1>}, {transform_indices = @transform_6, window_bounds = array<i64: 1, 8, 128>}]} {
    %c0 = arith.constant 0 : index
    %c0_0 = arith.constant 0 : index
    %c0_1 = arith.constant 0 : index
    %c0_2 = arith.constant 0 : index
    %0 = vector.load %arg2[%c0, %c0_0, %c0_1, %c0_2] : memref<1x1x4x160xbf16, #tpu.memory_space<vmem>>, vector<1x1x4x160xbf16>
    %1 = vector.shape_cast %0 : vector<1x1x4x160xbf16> to vector<4x160xbf16>
    %c0_3 = arith.constant 0 : index
    %c0_4 = arith.constant 0 : index
    %c0_5 = arith.constant 0 : index
    %2 = vector.load %arg3[%c0_3, %c0_4, %c0_5] : memref<3x160x160xbf16, #tpu.memory_space<vmem>>, vector<1x160x160xbf16>
    %3 = vector.shape_cast %2 : vector<1x160x160xbf16> to vector<160x160xbf16>
    %cst = arith.constant dense<0.000000e+00> : vector<4x160xf32>
    %4 = tpu.matmul %1, %3, %cst {dimension_numbers = #tpu.dot_dimension_numbers<[1], [0], [0], [1], [0, 0, 1, 1], [], []>} : vector<4x160xbf16>, vector<160x160xbf16>, vector<4x160xf32> -> vector<4x160xf32>
    %c1 = arith.constant 1 : index
    %c0_6 = arith.constant 0 : index
    %c0_7 = arith.constant 0 : index
    %5 = vector.load %arg3[%c1, %c0_6, %c0_7] : memref<3x160x160xbf16, #tpu.memory_space<vmem>>, vector<1x160x160xbf16>
    %6 = vector.shape_cast %5 : vector<1x160x160xbf16> to vector<160x160xbf16>
    %cst_8 = arith.constant dense<0.000000e+00> : vector<4x160xf32>
    %7 = tpu.matmul %1, %6, %cst_8 {dimension_numbers = #tpu.dot_dimension_numbers<[1], [0], [0], [1], [0, 0, 1, 1], [], []>} : vector<4x160xbf16>, vector<160x160xbf16>, vector<4x160xf32> -> vector<4x160xf32>
    %c2 = arith.constant 2 : index
    %c0_9 = arith.constant 0 : index
    %c0_10 = arith.constant 0 : index
    %8 = vector.load %arg3[%c2, %c0_9, %c0_10] : memref<3x160x160xbf16, #tpu.memory_space<vmem>>, vector<1x160x160xbf16>
    %9 = vector.shape_cast %8 : vector<1x160x160xbf16> to vector<160x160xbf16>
    %cst_11 = arith.constant dense<0.000000e+00> : vector<4x160xf32>
    %10 = tpu.matmul %1, %9, %cst_11 {dimension_numbers = #tpu.dot_dimension_numbers<[1], [0], [0], [1], [0, 0, 1, 1], [], []>} : vector<4x160xbf16>, vector<160x160xbf16>, vector<4x160xf32> -> vector<4x160xf32>
    %11 = tpu.concatenate %4, %7, %10 in 0 : vector<4x160xf32>, vector<4x160xf32>, vector<4x160xf32> -> vector<12x160xf32>
    %12 = arith.truncf %11 : vector<12x160xf32> to vector<12x160xbf16>
    %c0_12 = arith.constant 0 : index
    %c0_13 = arith.constant 0 : index
    %13 = vector.load %arg4[%c0_12, %c0_13] : memref<8x12xbf16, #tpu.memory_space<vmem>>, vector<8x12xbf16>
    %cst_14 = arith.constant dense<0.000000e+00> : vector<8x160xf32>
    %14 = tpu.matmul %13, %12, %cst_14 {dimension_numbers = #tpu.dot_dimension_numbers<[1], [0], [0], [1], [0, 0, 1, 1], [], []>} : vector<8x12xbf16>, vector<12x160xbf16>, vector<8x160xf32> -> vector<8x160xf32>
    %c0_15 = arith.constant 0 : index
    %c0_16 = arith.constant 0 : index
    %15 = vector.load %arg6[%c0_15, %c0_16] : memref<8x160xf32, #tpu.memory_space<vmem>>, vector<8x160xf32>
    %16 = arith.addf %14, %15 : vector<8x160xf32>
    %cst_17 = arith.constant 0.000000e+00 : f32
    %17 = vector.broadcast %cst_17 : f32 to vector<8x160xf32>
    %18 = arith.maximumf %16, %17 : vector<8x160xf32>
    %19 = tpu.iota {dimensions = array<i32: 1>} : vector<1x160xi32>
    %c128_i32 = arith.constant 128 : i32
    %20 = arith.muli %arg1, %c128_i32 : i32
    %21 = vector.broadcast %20 : i32 to vector<1x160xi32>
    %22 = arith.addi %21, %19 : vector<1x160xi32>
    %c16_i32 = arith.constant 16 : i32
    %23 = vector.broadcast %c16_i32 : i32 to vector<1x160xi32>
    %24 = arith.cmpi sge, %22, %23 : vector<1x160xi32>
    %c272_i32 = arith.constant 272 : i32
    %25 = vector.broadcast %c272_i32 : i32 to vector<1x160xi32>
    %26 = arith.cmpi slt, %22, %25 : vector<1x160xi32>
    %27 = arith.andi %24, %26 : vector<1x160xi1>
    %cst_18 = arith.constant 0.000000e+00 : f32
    %28 = vector.shape_cast %27 : vector<1x160xi1> to vector<1x160xi1>
    %29 = vector.broadcast %28 : vector<1x160xi1> to vector<8x160xi1>
    %30 = vector.broadcast %cst_18 : f32 to vector<8x160xf32>
    %31 = arith.select %29, %18, %30 : vector<8x160xi1>, vector<8x160xf32>
    %32 = vector.extract_strided_slice %31 {offsets = [0, 0], sizes = [8, 128], strides = [1, 1]} : vector<8x160xf32> to vector<8x128xf32>
    %33 = arith.truncf %32 : vector<8x128xf32> to vector<8x128xbf16>
    %34 = vector.extract_strided_slice %31 {offsets = [0, 16], sizes = [8, 128], strides = [1, 1]} : vector<8x160xf32> to vector<8x128xf32>
    %35 = arith.truncf %34 : vector<8x128xf32> to vector<8x128xbf16>
    %36 = vector.extract_strided_slice %31 {offsets = [0, 32], sizes = [8, 128], strides = [1, 1]} : vector<8x160xf32> to vector<8x128xf32>
    %37 = arith.truncf %36 : vector<8x128xf32> to vector<8x128xbf16>
    %38 = vector.extract_strided_slice %1 {offsets = [0, 16], sizes = [4, 128], strides = [1, 1]} : vector<4x160xbf16> to vector<4x128xbf16>
    %39 = tpu.concatenate %33, %35, %37, %38 in 0 : vector<8x128xbf16>, vector<8x128xbf16>, vector<8x128xbf16>, vector<4x128xbf16> -> vector<28x128xbf16>
    %c0_19 = arith.constant 0 : index
    %c0_20 = arith.constant 0 : index
    %40 = vector.load %arg5[%c0_19, %c0_20] : memref<8x28xbf16, #tpu.memory_space<vmem>>, vector<8x28xbf16>
    %cst_21 = arith.constant dense<0.000000e+00> : vector<8x128xf32>
    %41 = tpu.matmul %40, %39, %cst_21 {dimension_numbers = #tpu.dot_dimension_numbers<[1], [0], [0], [1], [0, 0, 1, 1], [], []>} : vector<8x28xbf16>, vector<28x128xbf16>, vector<8x128xf32> -> vector<8x128xf32>
    %c0_22 = arith.constant 0 : index
    %c0_23 = arith.constant 0 : index
    %42 = vector.load %arg7[%c0_22, %c0_23] : memref<8x1xf32, #tpu.memory_space<vmem>>, vector<8x1xf32>
    %43 = vector.broadcast %42 : vector<8x1xf32> to vector<8x128xf32>
    %44 = arith.addf %41, %43 : vector<8x128xf32>
    %cst_24 = arith.constant 0.000000e+00 : f32
    %45 = vector.broadcast %cst_24 : f32 to vector<8x128xf32>
    %46 = arith.maximumf %44, %45 : vector<8x128xf32>
    %c0_25 = arith.constant 0 : index
    %c0_26 = arith.constant 0 : index
    %c0_27 = arith.constant 0 : index
    %47 = vector.load %arg8[%c0_25, %c0_26, %c0_27] : memref<1x8x128xf32, #tpu.memory_space<vmem>>, vector<1x8x128xf32>
    %48 = vector.shape_cast %47 : vector<1x8x128xf32> to vector<8x128xf32>
    %49 = vector.shape_cast %46 : vector<8x128xf32> to vector<1x8x128xf32>
    tpu.vector_store %arg8[%c0_25, %c0_26, %c0_27], %49 {strides = array<i32>} : memref<1x8x128xf32, #tpu.memory_space<vmem>>, vector<1x8x128xf32>,
    return
  }
  func.func @transform_0(%arg0: i32, %arg1: i32) -> (i32, i32, i32, i32) {
    %c0_i32 = arith.constant 0 : i32
    %c0_i32_0 = arith.constant 0 : i32
    %c0_i32_1 = arith.constant 0 : i32
    return %arg0, %arg1, %c0_i32, %c0_i32_0 : i32, i32, i32, i32
  }
  func.func @transform_1(%arg0: i32, %arg1: i32) -> (i32, i32, i32) {
    %c0_i32 = arith.constant 0 : i32
    %c0_i32_0 = arith.constant 0 : i32
    %c0_i32_1 = arith.constant 0 : i32
    %c0_i32_2 = arith.constant 0 : i32
    return %c0_i32, %c0_i32_0, %c0_i32_1 : i32, i32, i32
  }
  func.func @transform_2(%arg0: i32, %arg1: i32) -> (i32, i32) {
    %c0_i32 = arith.constant 0 : i32
    %c0_i32_0 = arith.constant 0 : i32
    %c0_i32_1 = arith.constant 0 : i32
    return %c0_i32, %c0_i32_0 : i32, i32
  }
  func.func @transform_3(%arg0: i32, %arg1: i32) -> (i32, i32) {
    %c0_i32 = arith.constant 0 : i32
    %c0_i32_0 = arith.constant 0 : i32
    %c0_i32_1 = arith.constant 0 : i32
    return %c0_i32, %c0_i32_0 : i32, i32
  }
  func.func @transform_4(%arg0: i32, %arg1: i32) -> (i32, i32) {
    %c0_i32 = arith.constant 0 : i32
    %c0_i32_0 = arith.constant 0 : i32
    %c0_i32_1 = arith.constant 0 : i32
    return %c0_i32, %c0_i32_0 : i32, i32
  }
  func.func @transform_5(%arg0: i32, %arg1: i32) -> (i32, i32) {
    %c0_i32 = arith.constant 0 : i32
    %c0_i32_0 = arith.constant 0 : i32
    %c0_i32_1 = arith.constant 0 : i32
    return %c0_i32, %c0_i32_0 : i32, i32
  }
  func.func @transform_6(%arg0: i32, %arg1: i32) -> (i32, i32, i32) {
    %c0_i32 = arith.constant 0 : i32
    %c0_i32_0 = arith.constant 0 : i32
    return %arg0, %c0_i32, %arg1 : i32, i32, i32
  }
}

</mosaic_0001>

<bundles_post_ra>
// kernel: tile.9
= control target key start
LH: loop header
LB: loop body
LE: loop exit
PB: predicated region body
PF: predicated region fallthrough
CT: control target
= control target key end

     0   :  { %vm35_vm0 = vcmask 1043458   ;;  %vm40_vm1 = vcmask 1045508   ;;  %vm45_vm2 = vcmask 1047558   ;;  %s74_s6 = smov 3  ;;  %s77_s7 = smov 12  ;;  %vm4_vm3 = vcmask 1047556   ;;  %s452_s0 = inlined_call_operand.vmem [shape: f32[8,10,16], index: 0, kind: input, shape index: {}]   ;;  %s453_s1 = inlined_call_operand.vmem [shape: f32[8,160], index: 1, kind: output, shape index: {}]  }
   0x1   :  { %v223_v0 = vld [vmem:[%s452_s0 + $0x5] ss:$16 sm:%s74_s6]   ;;  %s82_s12 = smov 48  ;;  %s87_s13 = smov 192  ;;  %vm6_vm4 = vcmask 130048   ;;  %vm49_vm5 = vcmask 1048448  }
   0x2   :  { %v224_v1 = vld [vmem:[%s452_s0 + $0x5] ss:$16 sm:%s77_s7]   ;;  %s30_s18 = smov 3  ;;  %s33_s21 = smov 12  ;;  %vm71_vm6 = vcmask 917248   ;;  %vm93_vm7 = vcmask 786048  }
   0x3   :  { %v80_v2 = vsel %vm35_vm0, %v224_v1, %v223_v0  ;;  %v225_v3 = vld [vmem:[%s452_s0 + $0x5] ss:$16 sm:%s82_s12]   ;;  %v215_v6 = vld [vmem:[%s452_s0 + $0x7] ss:$16 sm:%s30_s18]   ;;  %s38_s22 = smov 48  ;;  %s43_s27 = smov 192 }
   0x4   :  { %v226_v4 = vld [vmem:[%s452_s0 + $0x5] ss:$16 sm:%s87_s13]   ;;  %v85_v5 = vsel %vm40_vm1, %v225_v3, %v80_v2  ;;  %v216_v8 = vld [vmem:[%s452_s0 + $0x7] ss:$16 sm:%s33_s21]   ;;  %s255_s28 = smov 80   ;;  %s96_s2 = smov 3 }
   0x5   :  { %v90_v7 = vsel %vm45_vm2, %v226_v4, %v85_v5  ;;  %v217_v9 = vld [vmem:[%s452_s0 + $0x7] ss:$16 sm:%s38_s22]   ;;  %v36_v10 = vsel %vm35_vm0, %v216_v8, %v215_v6  ;;  %s99_s3 = smov 12  ;;  %v227_v13 = vld [vmem:[%s452_s0 + $0x4] ss:$16 sm:%s96_s2]   ;;  %s104_s8 = smov 48 }
   0x6   :  { %91 = vrot.lane.b32.xlu1 %v90_v7, %s255_s28  ;;  %v218_v11 = vld [vmem:[%s452_s0 + $0x7] ss:$16 sm:%s43_s27]   ;;  %v41_v12 = vsel %vm40_vm1, %v217_v9, %v36_v10  ;;  %s109_s9 = smov 192  ;;  %s52_s14 = smov 3  ;;  %vm115_vm8 = vcmask 654848   ;;  %vm137_vm9 = vcmask 523648  }
   0x7   :  { %v228_v14 = vld [vmem:[%s452_s0 + $0x4] ss:$16 sm:%s99_s3]   ;;  %v46_v15 = vsel %vm45_vm2, %v218_v11, %v41_v12  ;;  %s256_s15 = smov 112   ;;  %v219_v20 = vld [vmem:[%s452_s0 + $0x6] ss:$16 sm:%s52_s14]   ;;  %s55_s18 = smov 12 }
   0x8   :  { %v102_v16 = vsel %vm35_vm0, %v228_v14, %v227_v13  ;;  %v229_v17 = vld [vmem:[%s452_s0 + $0x4] ss:$16 sm:%s104_s8]   ;;  %47 = vrot.lane.b32.xlu0 %v46_v15, %s256_s15  ;;  %s60_s19 = smov 48  ;;  %s65_s24 = smov 192  ;;  %vm159_vm10 = vcmask 392448   ;;  %vm181_vm11 = vcmask 261248  }
   0x9   :  { %v230_v18 = vld [vmem:[%s452_s0 + $0x4] ss:$16 sm:%s109_s9]   ;;  %v107_v19 = vsel %vm40_vm1, %v229_v17, %v102_v16  ;;  %v220_v21 = vld [vmem:[%s452_s0 + $0x6] ss:$16 sm:%s55_s18]   ;;  %s184_s27 = smov 3  ;;  %s187_s30 = smov 12 }
   0xa   :  { %v221_v22 = vld [vmem:[%s452_s0 + $0x6] ss:$16 sm:%s60_s19]   ;;  %v112_v23 = vsel %vm45_vm2, %v230_v18, %v107_v19  ;;  %v58_v24 = vsel %vm35_vm0, %v220_v21, %v219_v20  ;;  %v243_v27 = vld [vmem:[%s452_s0 + $0x9] ss:$16 sm:%s184_s27]   ;;  %s192_s2 = smov 48  ;;  %s197_s7 = smov 192 }
   0xb   :  { %v222_v25 = vld [vmem:[%s452_s0 + $0x6] ss:$16 sm:%s65_s24]   ;;  %v63_v26 = vsel %vm40_vm1, %v221_v22, %v58_v24  ;;  %v244_v28 = vld [vmem:[%s452_s0 + $0x9] ss:$16 sm:%s187_s30]   ;;  %s162_s8 = smov 3  ;;  %s257_s9 = smov 64  }
   0xc   :  { %v245_v29 = vld [vmem:[%s452_s0 + $0x9] ss:$16 sm:%s192_s2]   ;;  %v68_v30 = vsel %vm45_vm2, %v222_v25, %v63_v26  ;;  %v190_v31 = vsel %vm35_vm0, %v244_v28, %v243_v27  ;;  %s165_s10 = smov 12  ;;  %s170_s11 = smov 48  ;;  %v239_v32 = vld [vmem:[%s452_s0 + $0x1] ss:$16 sm:%s162_s8]  }
   0xd   :  { %v240_v33 = vld [vmem:[%s452_s0 + $0x1] ss:$16 sm:%s165_s10]   ;;  %s175_s16 = smov 192  ;;  %s118_s17 = smov 3  ;;  %v195_v34 = vsel %vm40_vm1, %v245_v29, %v190_v31  ;;  %v246_v35 = vld [vmem:[%s452_s0 + $0x9] ss:$16 sm:%s197_s7]  }
   0xe   :  { %113 = vrot.lane.b32.xlu1 %v112_v23, %s257_s9  ;;  %v168_v36 = vsel %vm35_vm0, %v240_v33, %v239_v32  ;;  %v241_v37 = vld [vmem:[%s452_s0 + $0x1] ss:$16 sm:%s170_s11]   ;;  %s121_s22 = smov 12  ;;  %s126_s23 = smov 48  ;;  %v200_v42 = vsel %vm45_vm2, %v246_v35, %v195_v34 }
   0xf   :  { %s258_s24 = smov 96   ;;  %v242_v38 = vld [vmem:[%s452_s0 + $0x1] ss:$16 sm:%s175_s16]   ;;  %v231_v39 = vld [vmem:[%s452_s0 + $0x3] ss:$16 sm:%s118_s17]   ;;  %s131_s29 = smov 192  ;;  %v173_v43 = vsel %vm40_vm1, %v241_v37, %v168_v36 }
  0x10   :  { %69 = vrot.lane.b32.xlu0 %v68_v30, %s258_s24  ;;  %v232_v40 = vld [vmem:[%s452_s0 + $0x3] ss:$16 sm:%s121_s22]   ;;  %s140_s5 = smov 3  ;;  %s143_s6 = smov 12  ;;  %v178_v52 = vsel %vm45_vm2, %v242_v38, %v173_v43 }
  0x11   :  { %v233_v41 = vld [vmem:[%s452_s0 + $0x3] ss:$16 sm:%s126_s23]   ;;  %v124_v44 = vsel %vm35_vm0, %v232_v40, %v231_v39  ;;  %v235_v46 = vld [vmem:[%s452_s0 + $0x2] ss:$16 sm:%s140_s5]   ;;  %s148_s11 = smov 48  ;;  %s153_s16 = smov 192 }
  0x12   :  { %v234_v45 = vld [vmem:[%s452_s0 + $0x3] ss:$16 sm:%s131_s29]   ;;  %v129_v47 = vsel %vm40_vm1, %v233_v41, %v124_v44  ;;  %v236_v48 = vld [vmem:[%s452_s0 + $0x2] ss:$16 sm:%s143_s6]   ;;  %s259_s17 = smov 16   ;;  %s260_s18 = smov 48  }
  0x13   :  { %v134_v49 = vsel %vm45_vm2, %v234_v45, %v129_v47  ;;  %v146_v50 = vsel %vm35_vm0, %v236_v48, %v235_v46  ;;  %v237_v51 = vld [vmem:[%s452_s0 + $0x2] ss:$16 sm:%s148_s11]   ;;  %s261_s21 = smov 32   ;;  %v2_v56 = vld [vmem:[%s452_s0] ss:$8 sm:$0xf]  }
  0x14   :  { %135 = vrot.lane.b32.xlu2 %v134_v49, %s260_s18  ;;  %v151_v53 = vsel %vm40_vm1, %v237_v51, %v146_v50  ;;  %v238_v54 = vld [vmem:[%s452_s0 + $0x2] ss:$16 sm:%s153_s16]   ;;  %v3_v57 = vld [vmem:[%s452_s0] ss:$8 sm:$0xf0]  }
  0x15   :  { %v156_v55 = vsel %vm45_vm2, %v238_v54, %v151_v53  ;;  %v5_v58 = vsel %vm4_vm3, %v3_v57, %v2_v56  ;;  %v209_v59 = vld [vmem:[%s452_s0 + $0x40] ss:$8 sm:$0xf]  }
  0x16   :  { %201 = vrot.lane.b32.xlu1 %v200_v42, %s259_s17  ;;  %7 = vst.msk [vmem:[%s453_s1] ss:$8 sm:$0x3] %vm6_vm4, %v5_v58   ;;  %v210_v60 = vld [vmem:[%s452_s0 + $0x40] ss:$8 sm:$0xf0]  }
  0x17   :  { %206 = vst.msk [vmem:[%s453_s1 - $0xf] ss:$8 sm:$0xc] %vm6_vm4, %v5_v58   ;;  %v19_v61 = vsel %vm4_vm3, %v210_v60, %v209_v59 }
  0x18   :  { %179 = vrot.lane.b32.xlu0 %v178_v52, %s259_s17  ;;  %207 = vst.msk [vmem:[%s453_s1 - $0x1e] ss:$8 sm:$0x30] %vm6_vm4, %v5_v58  }
  0x19   :  { %208 = vst.msk [vmem:[%s453_s1 - $0x2d] ss:$8 sm:$0xc0] %vm6_vm4, %v5_v58  }
  0x1a   :  { %211 = vst.msk [vmem:[%s453_s1 + $0x4] ss:$8 sm:$0x3] %vm6_vm4, %v19_v61  }
  0x1b   :  { %212 = vst.msk [vmem:[%s453_s1 - $0xb] ss:$8 sm:$0xc] %vm6_vm4, %v19_v61  }
  0x1c   :  { %157 = vrot.lane.b32.xlu2 %v156_v55, %s261_s21  ;;  %213 = vst.msk [vmem:[%s453_s1 - $0x1a] ss:$8 sm:$0x30] %vm6_vm4, %v19_v61  }
  0x1d   :  { %214 = vst.msk [vmem:[%s453_s1 - $0x29] ss:$8 sm:$0xc0] %vm6_vm4, %v19_v61  }
  0x6e   :  { %v136_v62 = vpop.permute.xlu2 %135  }
  0x76   :  { %v158_v0 = vpop.permute.xlu2 %157  }
  0x78   :  { %v92_v63 = vpop.permute.xlu1 %91  }
  0x7a   :  { %v48_v1 = vpop.permute.xlu0 %47  }
  0x7b   :  { %50 = vst.msk [vmem:[%s453_s1] sm:$0xff] %vm49_vm5, %v48_v1  }
  0x80   :  { %v114_v2 = vpop.permute.xlu1 %113  }
  0x82   :  { %v70_v3 = vpop.permute.xlu0 %69  }
  0x83   :  { %72 = vst.msk [vmem:[%s453_s1] sm:$0xff] %vm71_vm6, %v70_v3  }
  0x84   :  { %94 = vst.msk [vmem:[%s453_s1] sm:$0xff] %vm93_vm7, %v92_v63  }
  0x85   :  { %116 = vst.msk [vmem:[%s453_s1] sm:$0xff] %vm115_vm8, %v114_v2  }
  0x86   :  { %138 = vst.msk [vmem:[%s453_s1] sm:$0xff] %vm137_vm9, %v136_v62  }
  0x87   :  { %160 = vst.msk [vmem:[%s453_s1] sm:$0xff] %vm159_vm10, %v158_v0  }
  0x88   :  { %v202_v4 = vpop.permute.xlu1 %201  }
  0x89   :  { %247 = vst.msk [vmem:[%s453_s1 + $0x8] sm:$0xff] %vm181_vm11, %v202_v4  }
  0x8a   :  { %v180_v5 = vpop.permute.xlu0 %179  }
  0x8b   :  { %182 = vst.msk [vmem:[%s453_s1] sm:$0xff] %vm181_vm11, %v180_v5  }

// kernel: st_gcn_forward.1
= control target key start
LH: loop header
LB: loop body
LE: loop exit
PB: predicated region body
PF: predicated region fallthrough
CT: control target
= control target key end

     0   :  { %s1536_s21 = smov 0   ;;  %s1538_s22 = smov 0   ;;  %s2010_s0 = inlined_call_operand.vmem [shape: bf16[2,2,4,160], index: 0, kind: input, shape index: {}]   ;;  %s2011_s1 = inlined_call_operand.vmem [shape: bf16[3,160,160], index: 1, kind: input, shape index: {}]   ;;  %s2012_s2 = inlined_call_operand.vmem [shape: bf16[8,12], index: 2, kind: input, shape index: {}]   ;;  %s2013_s3 = inlined_call_operand.vmem [shape: bf16[8,28], index: 3, kind: input, shape index: {}]   ;;  %s2014_s4 = inlined_call_operand.vmem [shape: f32[8,160], index: 4, kind: input, shape index: {}]   ;;  %s2015_s5 = inlined_call_operand.vmem [shape: f32[8,1], index: 5, kind: input, shape index: {}]   ;;  %s2016_s6 = inlined_call_operand.vmem [shape: f32[2,8,256], index: 6, kind: output, shape index: {}]  }
   0x1   :  { %s1540_s23 = smov 0   ;;  %s1542_s24 = smov 0  }
   0x2   :  { %s1544_s25 = smov 0  }
   0x3 LB: > { %s25_s26 = sadd.s32 1, %s1488_s23  ;;  %s28_s27 = sadd.s32 1, %s1492_s24  ;;  %s1496_s25 = sphi %s1544_s25, %s16_s25   ;;  %s1492_s24 = sphi %s1542_s24, %s2020_s24   ;;  %s1488_s23 = sphi %s1540_s23, %s2019_s23   ;;  %s1484_s22 = sphi %s1538_s22, %s2018_s22   ;;  %s1480_s21 = sphi %s1536_s21, %s2017_s21  }
   0x4   : > { %p26_p0 = scmp.ge.s32.totalorder %s25_s26, 2  ;;  %p1056_p1 = scmp.ge.s32.totalorder %s1496_s25, 1 }
   0x5   : > { %p232_p2 = scmp.lt.s32.totalorder %s1496_s25, 5 }
   0x6   : > { %s2022_s26 = smov (%p26_p0, %s25_s26), 0  ;;  %s2024_s27 = smov (!%p26_p0, %s28_s27), %s1492_s24 }
   0x7   : > { %p233_p3 = pnand %p1056_p1, %p232_p2  ;;  %p30_p4 = scmp.ge.s32.totalorder %s2024_s27, 2 }
   0x8   : > { %p269_p5 = scmp.lt.s32.totalorder (!%p233_p3), %s1484_s22, 1  ;;  %p271_p6 = scmp.lt.s32.totalorder (!%p233_p3), %s1480_s21, 1 }
   0x9   : > { %s2026_s27 = smov (%p30_p4, %s2024_s27), 0  ;;  %236 = sbr.rel (%p233_p3) target bundleno = 633 (0x279), region = 44 }
   0xa   : > { %s1498_s11 = smov (!%p233_p3), 112   ;;  %s1350_s12 = sshll.u32 (!%p233_p3), %s1480_s21, 7 }
   0xe   : > { %v1120_v0 = vld [vmem:[%s2011_s1 + $0x70] sm:$0xf]  ;;  %v1369_v1 = vld [vmem:[%s2011_s1 + $0x74] sm:$0xf0]  ;;  %v1368_v5 = vld [vmem:[%s2011_s1 + $0x74] sm:$0xf] }
   0xf   : > { %v1136_v2 = vld [vmem:[%s2011_s1 + $0x90] sm:$0xf]  ;;  %v1121_v3 = vor.u32 %v1369_v1, %v1120_v0  ;;  %v1373_v4 = vld [vmem:[%s2011_s1 + $0x94] sm:$0xf0]  ;;  %v1122_v6 = vld [vmem:[%s2011_s1 + $0x78] sm:$0xf0] }
  0x10   : > { %v1137_v7 = vor.u32 %v1373_v4, %v1136_v2  ;;  %v1125_v8 = vor.u32 %v1368_v5, %v1122_v6  ;;  %v1112_v9 = vld [vmem:[%s2011_s1 + $0x60] sm:$0xf]  ;;  %v1367_v10 = vld [vmem:[%s2011_s1 + $0x64] sm:$0xf0]  ;;  %v1366_v14 = vld [vmem:[%s2011_s1 + $0x64] sm:$0xf] }
  0x11   : > { %v1128_v11 = vld [vmem:[%s2011_s1 + $0x80] sm:$0xf]  ;;  %416 = vmatpush.bf16.msra.mxu0 %v1121_v3  ;;  %v1113_v12 = vor.u32 %v1367_v10, %v1112_v9  ;;  %v1371_v13 = vld [vmem:[%s2011_s1 + $0x84] sm:$0xf0]  ;;  %v1114_v15 = vld [vmem:[%s2011_s1 + $0x68] sm:$0xf0] }
  0x12   : > { %435 = vmatpush.bf16.msra.mxu1 %v1137_v7  ;;  %442 = vmatpush.bf16.msra.mxu2 %v1125_v8  ;;  %v1129_v16 = vor.u32 %v1371_v13, %v1128_v11  ;;  %v1117_v17 = vor.u32 %v1366_v14, %v1114_v15  ;;  %v1372_v18 = vld [vmem:[%s2011_s1 + $0x94] sm:$0xf]  ;;  %v1138_v19 = vld [vmem:[%s2011_s1 + $0x98] sm:$0xf0]  ;;  %v1222_v20 = vld [vmem:[%s2011_s1 + $0x110] sm:$0xf] }
  0x13   : > { %v1141_v21 = vor.u32 %v1372_v18, %v1138_v19  ;;  %v1389_v22 = vld [vmem:[%s2011_s1 + $0x114] sm:$0xf0]  ;;  %v1104_v23 = vld [vmem:[%s2011_s1 + $0x50] sm:$0xf]  ;;  %v1364_v26 = vld [vmem:[%s2011_s1 + $0x54] sm:$0xf] }
  0x14   : > { %v1365_v24 = vld [vmem:[%s2011_s1 + $0x54] sm:$0xf0]  ;;  %v1223_v25 = vor.u32 %v1389_v22, %v1222_v20  ;;  %v1106_v27 = vld [vmem:[%s2011_s1 + $0x58] sm:$0xf0]  ;;  %v1370_v28 = vld [vmem:[%s2011_s1 + $0x84] sm:$0xf] }
  0x15   : > { %417 = vmatpush.bf16.msra.mxu0 %v1113_v12  ;;  %461 = vmatpush.bf16.msra.mxu3 %v1141_v21  ;;  %v1105_v29 = vor.u32 %v1365_v24, %v1104_v23  ;;  %v1130_v30 = vld [vmem:[%s2011_s1 + $0x88] sm:$0xf0]  ;;  %v1214_v31 = vld [vmem:[%s2011_s1 + $0x100] sm:$0xf]  ;;  %v1387_v32 = vld [vmem:[%s2011_s1 + $0x104] sm:$0xf0]  ;;  %v1109_v33 = vor.u32 %v1364_v26, %v1106_v27 }
  0x16   : > { %436 = vmatpush.bf16.msra.mxu1 %v1129_v16  ;;  %443 = vmatpush.bf16.msra.mxu2 %v1117_v17  ;;  %v1133_v34 = vor.u32 %v1370_v28, %v1130_v30  ;;  %v1238_v35 = vld [vmem:[%s2011_s1 + $0x130] sm:$0xf]  ;;  %v1393_v36 = vld [vmem:[%s2011_s1 + $0x134] sm:$0xf0]  ;;  %v1096_v37 = vld [vmem:[%s2011_s1 + $0x40] sm:$0xf]  ;;  %v1215_v38 = vor.u32 %v1387_v32, %v1214_v31 }
  0x17   : > { %v1239_v39 = vor.u32 %v1393_v36, %v1238_v35  ;;  %v1363_v40 = vld [vmem:[%s2011_s1 + $0x44] sm:$0xf0]  ;;  %v1362_v41 = vld [vmem:[%s2011_s1 + $0x44] sm:$0xf]  ;;  %v1098_v42 = vld [vmem:[%s2011_s1 + $0x48] sm:$0xf0] }
  0x18   : > { %v1206_v43 = vld [vmem:[%s2011_s1 + $0xf0] sm:$0xf]  ;;  %v1385_v44 = vld [vmem:[%s2011_s1 + $0xf4] sm:$0xf0]  ;;  %v1097_v45 = vor.u32 %v1363_v40, %v1096_v37  ;;  %v1230_v46 = vld [vmem:[%s2011_s1 + $0x120] sm:$0xf]  ;;  %v1101_v48 = vor.u32 %v1362_v41, %v1098_v42 }
  0x19   : > { %418 = vmatpush.bf16.msra.mxu0 %v1105_v29  ;;  %462 = vmatpush.bf16.msra.mxu3 %v1133_v34  ;;  %v1391_v47 = vld [vmem:[%s2011_s1 + $0x124] sm:$0xf0]  ;;  %s2028_s22 = smov (!%p269_p5, %s1484_s22), 1  ;;  %v1207_v50 = vor.u32 %v1385_v44, %v1206_v43  ;;  %v1088_v51 = vld [vmem:[%s2011_s1 + $0x30] sm:$0xf]  ;;  %vm413_vm0 = vcmask 261120  }
  0x1a   : > { %595 = vmatpush.bf16.msrb.mxu1 %v1223_v25  ;;  %444 = vmatpush.bf16.msra.mxu2 %v1109_v33  ;;  %v1231_v49 = vor.u32 %v1391_v47, %v1230_v46  ;;  %s1678_s28 = scalar_select %p271_p6, %s1480_s21, 1  ;;  %v1361_v52 = vld [vmem:[%s2011_s1 + $0x34] sm:$0xf0]  ;;  %v1360_v53 = vld [vmem:[%s2011_s1 + $0x34] sm:$0xf]  ;;  %vm832_vm1 = vcmask 1043456  }
  0x1b   : > { %s1058_s9 = sshll.u32 %s2028_s22, 2  ;;  %v1090_v54 = vld [vmem:[%s2011_s1 + $0x38] sm:$0xf0]  ;;  %v1089_v55 = vor.u32 %v1361_v52, %v1088_v51  ;;  %v1198_v56 = vld [vmem:[%s2011_s1 + $0xe0] sm:$0xf]  ;;  %vm844_vm2 = vcmask 1045504  }
  0x1c   : > { %s1057_s14 = sshll.u32 %s1678_s28, 1  ;;  %v1383_v57 = vld [vmem:[%s2011_s1 + $0xe4] sm:$0xf0]  ;;  %v1093_v58 = vor.u32 %v1360_v53, %v1090_v54  ;;  %v1080_v59 = vld [vmem:[%s2011_s1 + $0x20] sm:$0xf]  ;;  %vm840_vm3 = vcmask 97280  }
  0x1d   : > { %614 = vmatpush.bf16.msrb.mxu3 %v1239_v39  ;;  %419 = vmatpush.bf16.msra.mxu0 %v1097_v45  ;;  %s275_s19 = sadd.s32 %s1058_s9, %s1057_s14  ;;  %v1199_v60 = vor.u32 %v1383_v57, %v1198_v56  ;;  %v1359_v61 = vld [vmem:[%s2011_s1 + $0x24] sm:$0xf0]  ;;  %v1358_v62 = vld [vmem:[%s2011_s1 + $0x24] sm:$0xf]  ;;  %v1082_v63 = vld [vmem:[%s2011_s1 + $0x28] sm:$0xf0] }
  0x1e   : > { %596 = vmatpush.bf16.msrb.mxu1 %v1215_v38  ;;  %445 = vmatpush.bf16.msra.mxu2 %v1101_v48  ;;  %s1059_s30 = sshll.u32 %s275_s19, 1  ;;  %v1190_v0 = vld [vmem:[%s2011_s1 + $0xd0] sm:$0xf]  ;;  %v1381_v1 = vld [vmem:[%s2011_s1 + $0xd4] sm:$0xf0]  ;;  %v1081_v3 = vor.u32 %v1359_v61, %v1080_v59  ;;  %v1085_v4 = vor.u32 %v1358_v62, %v1082_v63  ;;  %s1499_s21 = smov 96  }
  0x1f   : > { %s277_s9 = scalar_lea.vmem %s2010_s0, %s1059_s30  ;;  %v1072_v5 = vld [vmem:[%s2011_s1 + $0x10] sm:$0xf]  ;;  %v1357_v6 = vld [vmem:[%s2011_s1 + $0x14] sm:$0xf0]  ;;  %v1388_v7 = vld [vmem:[%s2011_s1 + $0x114] sm:$0xf]  ;;  %v1191_v8 = vor.u32 %v1381_v1, %v1190_v0 }
  0x20   : > { %v1721_v2 = vld [vmem:[%s277_s9] sm:$0xf]  ;;  %v1224_v9 = vld [vmem:[%s2011_s1 + $0x118] sm:$0xf0]  ;;  %v1356_v10 = vld [vmem:[%s2011_s1 + $0x14] sm:$0xf]  ;;  %v1073_v12 = vor.u32 %v1357_v6, %v1072_v5 }
  0x21   : > { %615 = vmatpush.bf16.msrb.mxu3 %v1231_v49  ;;  %420 = vmatpush.bf16.msra.mxu0 %v1089_v55  ;;  %309 = vst [vmem:[#allocation1] ss:$4 sm:$0xff] %v1721_v2  ;;  %v1074_v11 = vld [vmem:[%s2011_s1 + $0x18] sm:$0xf0]  ;;  %v1182_v13 = vld [vmem:[%s2011_s1 + $0xc0] sm:$0xf]  ;;  %v1227_v21 = vor.u32 %v1388_v7, %v1224_v9 }
  0x22   : > { %597 = vmatpush.bf16.msrb.mxu1 %v1207_v50  ;;  %446 = vmatpush.bf16.msra.mxu2 %v1093_v58  ;;  %v1379_v14 = vld [vmem:[%s2011_s1 + $0xc4] sm:$0xf0]  ;;  %v1064_v15 = vld [vmem:[%s2011_s1] sm:$0xf]  ;;  %v1386_v16 = vld [vmem:[%s2011_s1 + $0x104] sm:$0xf]  ;;  %v1077_v22 = vor.u32 %v1356_v10, %v1074_v11 }
  0x23   : > { %v1216_v17 = vld [vmem:[%s2011_s1 + $0x108] sm:$0xf0]  ;;  %v1355_v18 = vld [vmem:[%s2011_s1 + $0x4] sm:$0xf0]  ;;  %v1354_v19 = vld [vmem:[%s2011_s1 + $0x4] sm:$0xf]  ;;  %v1183_v26 = vor.u32 %v1379_v14, %v1182_v13 }
  0x24   : > { %v1066_v20 = vld [vmem:[%s2011_s1 + $0x8] sm:$0xf0]  ;;  %v1174_v23 = vld [vmem:[%s2011_s1 + $0xb0] sm:$0xf]  ;;  %v1392_v24 = vld [vmem:[%s2011_s1 + $0x134] sm:$0xf]  ;;  %v1065_v32 = vor.u32 %v1355_v18, %v1064_v15  ;;  %v1219_v35 = vor.u32 %v1386_v16, %v1216_v17 }
  0x25   : > { %421 = vmatpush.bf16.msra.mxu0 %v1081_v3  ;;  %v1240_v25 = vld [vmem:[%s2011_s1 + $0x138] sm:$0xf0]  ;;  %v1377_v27 = vld [vmem:[%s2011_s1 + $0xb4] sm:$0xf0]  ;;  %v1324_v28 = vld [vmem:[%s2011_s1 + $0x1b0] sm:$0xf]  ;;  %v1069_v37 = vor.u32 %v1354_v19, %v1066_v20 }
  0x26   : > { %598 = vmatpush.bf16.msrb.mxu1 %v1199_v60  ;;  %447 = vmatpush.bf16.msra.mxu2 %v1085_v4  ;;  %v1409_v29 = vld [vmem:[%s2011_s1 + $0x1b4] sm:$0xf0]  ;;  %v1384_v33 = vld [vmem:[%s2011_s1 + $0xf4] sm:$0xf]  ;;  %v1243_v34 = vor.u32 %v1392_v24, %v1240_v25  ;;  %v1208_v36 = vld [vmem:[%s2011_s1 + $0xf8] sm:$0xf0]  ;;  %v1175_v40 = vor.u32 %v1377_v27, %v1174_v23 }
  0x27   : > { %v1390_v38 = vld [vmem:[%s2011_s1 + $0x124] sm:$0xf]  ;;  %v1232_v39 = vld [vmem:[%s2011_s1 + $0x128] sm:$0xf0]  ;;  %v1325_v41 = vor.u32 %v1409_v29, %v1324_v28  ;;  %v1166_v42 = vld [vmem:[%s2011_s1 + $0xa0] sm:$0xf]  ;;  %v1211_v49 = vor.u32 %v1384_v33, %v1208_v36 }
  0x28   : > { %v310_v30 = vld.sshfl [vmem:[#allocation1] sm:$0xff pattern:$0x73625140]  ;;  %v311_v31 = vld.sshfl [vmem:[#allocation1 + $0x8] sm:$0xff pattern:$0x73625140]  ;;  %v1235_v48 = vor.u32 %v1390_v38, %v1232_v39 }
  0x29   : > { %422 = vmatpush.bf16.msra.mxu0 %v1073_v12  ;;  %1142 = vmatmul.msk.bf16.vlgmr.msra.gmra.mxu1 %vm413_vm0, %v311_v31  ;;  %489 = vst [vmem:[#allocation1] ss:$4 sm:$0xff] %v1721_v2  ;;  %v1408_v43 = vld [vmem:[%s2011_s1 + $0x1b4] sm:$0xf]  ;;  %v1326_v44 = vld [vmem:[%s2011_s1 + $0x1b8] sm:$0xf0] }
  0x2a   : > { %599 = vmatpush.bf16.msrb.mxu1 %v1191_v8  ;;  %1143 = vmatmul.msk.bf16.vlgmr.msra.gmra.mxu3 %vm413_vm0, %v311_v31  ;;  %v1375_v45 = vld [vmem:[%s2011_s1 + $0xa4] sm:$0xf0]  ;;  %v1316_v46 = vld [vmem:[%s2011_s1 + $0x1a0] sm:$0xf]  ;;  %v1382_v50 = vld [vmem:[%s2011_s1 + $0xe4] sm:$0xf]  ;;  %v1329_v52 = vor.u32 %v1408_v43, %v1326_v44 }
  0x2b   : > { %621 = vmatpush.bf16.msra.mxu3 %v1227_v21  ;;  %448 = vmatpush.bf16.msra.mxu2 %v1077_v22  ;;  %v1407_v47 = vld [vmem:[%s2011_s1 + $0x1a4] sm:$0xf0]  ;;  %v1200_v51 = vld [vmem:[%s2011_s1 + $0xe8] sm:$0xf0]  ;;  %v1308_v53 = vld [vmem:[%s2011_s1 + $0x190] sm:$0xf]  ;;  %v1167_v54 = vor.u32 %v1375_v45, %v1166_v42 }
  0x2c   : > { %v1317_v55 = vor.u32 %v1407_v47, %v1316_v46  ;;  %v1405_v56 = vld [vmem:[%s2011_s1 + $0x194] sm:$0xf0]  ;;  %v1406_v57 = vld [vmem:[%s2011_s1 + $0x1a4] sm:$0xf]  ;;  %v1318_v58 = vld [vmem:[%s2011_s1 + $0x1a8] sm:$0xf0]  ;;  %v1203_v61 = vor.u32 %v1382_v50, %v1200_v51 }
  0x2d   : > { %423 = vmatpush.bf16.msra.mxu0 %v1065_v32  ;;  %v1380_v62 = vld [vmem:[%s2011_s1 + $0xd4] sm:$0xf]  ;;  %v1192_v63 = vld [vmem:[%s2011_s1 + $0xd8] sm:$0xf0]  ;;  %v1321_v0 = vor.u32 %v1406_v57, %v1318_v58  ;;  %v1340_v1 = vld [vmem:[%s2011_s1 + $0x1d0] sm:$0xf]  ;;  %v1309_v3 = vor.u32 %v1405_v56, %v1308_v53 }
  0x2e   : > { %600 = vmatpush.bf16.msrb.mxu1 %v1183_v26  ;;  %v1404_v4 = vld [vmem:[%s2011_s1 + $0x194] sm:$0xf]  ;;  %v1310_v5 = vld [vmem:[%s2011_s1 + $0x198] sm:$0xf0]  ;;  %v1413_v6 = vld [vmem:[%s2011_s1 + $0x1d4] sm:$0xf0]  ;;  %v1195_v12 = vor.u32 %v1380_v62, %v1192_v63 }
  0x2f   : > { %622 = vmatpush.bf16.msra.mxu3 %v1219_v35  ;;  %449 = vmatpush.bf16.msra.mxu2 %v1069_v37  ;;  %v1300_v7 = vld [vmem:[%s2011_s1 + $0x180] sm:$0xf]  ;;  %v1403_v8 = vld [vmem:[%s2011_s1 + $0x184] sm:$0xf0]  ;;  %v1341_v9 = vor.u32 %v1413_v6, %v1340_v1  ;;  %v1378_v13 = vld [vmem:[%s2011_s1 + $0xc4] sm:$0xf]  ;;  %v1313_v14 = vor.u32 %v1404_v4, %v1310_v5 }
  0x30   : > { %v1835_v59 = vld.sshfl [vmem:[#allocation1 + $0x8] sm:$0xff pattern:$0x73625140]  ;;  %424 = vmatmul.bf16.vlgmr.msra.gmra.mxu0 %v310_v30  ;;  %v1837_v60 = vld.sshfl [vmem:[#allocation1] sm:$0xff pattern:$0x73625140]  ;;  %v1301_v16 = vor.u32 %v1403_v8, %v1300_v7 }
  0x31   : > { %640 = vmatpush.bf16.msrb.mxu0 %v1243_v34  ;;  %668 = vst [vmem:[#allocation1] ss:$4 sm:$0xff] %v1721_v2  ;;  %v1332_v10 = vld [vmem:[%s2011_s1 + $0x1c0] sm:$0xf]  ;;  %v1411_v11 = vld [vmem:[%s2011_s1 + $0x1c4] sm:$0xf0] }
  0x32   : > { %601 = vmatpush.bf16.msrb.mxu1 %v1175_v40  ;;  %450 = vmatmul.bf16.vlgmr.msra.gmra.mxu2 %v310_v30  ;;  %v1184_v15 = vld [vmem:[%s2011_s1 + $0xc8] sm:$0xf0]  ;;  %v1402_v17 = vld [vmem:[%s2011_s1 + $0x184] sm:$0xf]  ;;  %v1333_v19 = vor.u32 %v1411_v11, %v1332_v10  ;;  %v1292_v20 = vld [vmem:[%s2011_s1 + $0x170] sm:$0xf] }
  0x33   : > { %774 = vmatpush.bf16.msrb.mxu2 %v1325_v41  ;;  %623 = vmatpush.bf16.msra.mxu3 %v1211_v49  ;;  %v1302_v18 = vld [vmem:[%s2011_s1 + $0x188] sm:$0xf0]  ;;  %v1401_v21 = vld [vmem:[%s2011_s1 + $0x174] sm:$0xf0]  ;;  %v1376_v22 = vld [vmem:[%s2011_s1 + $0xb4] sm:$0xf]  ;;  %v1187_v26 = vor.u32 %v1378_v13, %v1184_v15 }
  0x34   : > { %v1176_v23 = vld [vmem:[%s2011_s1 + $0xb8] sm:$0xf0]  ;;  %v1305_v27 = vor.u32 %v1402_v17, %v1302_v18  ;;  %v1412_v28 = vld [vmem:[%s2011_s1 + $0x1d4] sm:$0xf]  ;;  %v1293_v30 = vor.u32 %v1401_v21, %v1292_v20  ;;  %v1410_v33 = vld [vmem:[%s2011_s1 + $0x1c4] sm:$0xf] }
  0x35   : > { %641 = vmatpush.bf16.msrb.mxu0 %v1235_v48  ;;  %v1342_v29 = vld [vmem:[%s2011_s1 + $0x1d8] sm:$0xf0]  ;;  %v1400_v31 = vld [vmem:[%s2011_s1 + $0x174] sm:$0xf]  ;;  %v1284_v34 = vld [vmem:[%s2011_s1 + $0x160] sm:$0xf]  ;;  %v1179_v38 = vor.u32 %v1376_v22, %v1176_v23 }
  0x36   : > { %602 = vmatpush.bf16.msrb.mxu1 %v1167_v54  ;;  %v1294_v32 = vld [vmem:[%s2011_s1 + $0x178] sm:$0xf0]  ;;  %v1399_v35 = vld [vmem:[%s2011_s1 + $0x164] sm:$0xf0]  ;;  %v1334_v36 = vld [vmem:[%s2011_s1 + $0x1c8] sm:$0xf0] }
  0x37   : > { %775 = vmatpush.bf16.msrb.mxu2 %v1317_v55  ;;  %624 = vmatpush.bf16.msra.mxu3 %v1203_v61  ;;  %v1337_v37 = vor.u32 %v1410_v33, %v1334_v36  ;;  %v1374_v39 = vld [vmem:[%s2011_s1 + $0xa4] sm:$0xf]  ;;  %v1297_v40 = vor.u32 %v1400_v31, %v1294_v32  ;;  %v1168_v41 = vld [vmem:[%s2011_s1 + $0xa8] sm:$0xf0]  ;;  %v1285_v42 = vor.u32 %v1399_v35, %v1284_v34  ;;  %v1276_v45 = vld [vmem:[%s2011_s1 + $0x150] sm:$0xf]  ;;  %v879_v36 = vlaneseq }
  0x38   : > { %v670_v24 = vld.sshfl [vmem:[#allocation1 + $0x8] sm:$0xff pattern:$0x73625140]  ;;  %v669_v25 = vld.sshfl [vmem:[#allocation1] sm:$0xff pattern:$0x73625140]  ;;  %v1171_v47 = vor.u32 %v1374_v39, %v1168_v41 }
  0x39   : > { %800 = vmatpush.bf16.msra.mxu0 %v1329_v52  ;;  %603 = vmatmul.bf16.vlgmr.msrb.gmra.mxu1 %v1837_v60  ;;  %918 = vst [vmem:[#allocation1 + $0x2] ss:$4 sm:$0xff] %v1721_v2  ;;  %v1345_v2 = vor.u32 %v1412_v28, %v1342_v29  ;;  %v1398_v43 = vld [vmem:[%s2011_s1 + $0x164] sm:$0xf]  ;;  %v1286_v44 = vld [vmem:[%s2011_s1 + $0x168] sm:$0xf0] }
  0x3a   : > { %793 = vmatpush.bf16.msra.mxu1 %v1341_v9  ;;  %1244 = vmatmul.msk.bf16.vlgmr.msrb.gmra.mxu3 %vm413_vm0, %v1835_v59  ;;  %v1397_v46 = vld [vmem:[%s2011_s1 + $0x154] sm:$0xf0]  ;;  %v1289_v48 = vor.u32 %v1398_v43, %v1286_v44  ;;  %v1396_v50 = vld [vmem:[%s2011_s1 + $0x154] sm:$0xf]  ;;  %v1278_v51 = vld [vmem:[%s2011_s1 + $0x158] sm:$0xf0] }
  0x3b   : > { %776 = vmatpush.bf16.msrb.mxu2 %v1309_v3  ;;  %625 = vmatpush.bf16.msra.mxu3 %v1195_v12  ;;  %v1277_v49 = vor.u32 %v1397_v46, %v1276_v45  ;;  %v1268_v52 = vld [vmem:[%s2011_s1 + $0x140] sm:$0xf]  ;;  %v1395_v53 = vld [vmem:[%s2011_s1 + $0x144] sm:$0xf0]  ;;  %v1281_v54 = vor.u32 %v1396_v50, %v1278_v51  ;;  %v1394_v56 = vld [vmem:[%s2011_s1 + $0x144] sm:$0xf] }
  0x3c   : > { %v1269_v55 = vor.u32 %v1395_v53, %v1268_v52  ;;  %v1270_v57 = vld [vmem:[%s2011_s1 + $0x148] sm:$0xf0]  ;;  %v837_v29 = vld [vmem:[%s2012_s2] sm:$0xf]  ;;  %vm915_vm10 = vcmask 785408   ;;  %vm909_vm11 = vcmask 916480  }
  0x3d   : > { %801 = vmatpush.bf16.msra.mxu0 %v1321_v0  ;;  %v1273_v58 = vor.u32 %v1394_v56, %v1270_v57  ;;  %v839_v45 = vld [vmem:[%s2014_s4 + $0x8] sm:$0xff]  ;;  %vm942_vm12 = vcmask 228352   ;;  %s1060_s20 = sshll.u32 %s2028_s22, 1 }
  0x3e   : > { %794 = vmatpush.bf16.msra.mxu1 %v1333_v19  ;;  %s283_s29 = sadd.s32 %s1060_s20, %s1678_s28 }
  0x3f   : > { %777 = vmatpush.bf16.msrb.mxu2 %v1301_v16  ;;  %626 = vmatpush.bf16.msra.mxu3 %v1187_v26  ;;  %s1061_s30 = sshll.u32 %s283_s29, 3 }
  0x40   : > { %1245 = vmatmul.msk.bf16.vlgmr.msrb.gmra.mxu0 %vm413_vm0, %v1835_v59  ;;  %v919_v34 = vld.sshfl [vmem:[#allocation1] sm:$0xff pattern:$0x73625140]  ;;  %v921_v35 = vld.sshfl [vmem:[#allocation1 + $0x8] sm:$0xff pattern:$0x73625140]  ;;  %s285_s10 = scalar_lea.vmem %s2016_s6, %s1061_s30 }
  0x41   : > { %802 = vmatpush.bf16.msra.mxu0 %v1313_v14  ;;  %923 = vrot.lane.b32.xlu1 %v919_v34, %s1498_s11 }
  0x42   : > { %819 = vmatpush.bf16.msrb.mxu1 %v1345_v2 }
  0x43   : > { %778 = vmatpush.bf16.msrb.mxu2 %v1293_v30  ;;  %627 = vmatpush.bf16.msra.mxu3 %v1179_v38  ;;  %v883_v38 = vstv %s1350_s12 }
  0x45   : > { %803 = vmatpush.bf16.msra.mxu0 %v1305_v27 }
  0x46   : > { %820 = vmatpush.bf16.msrb.mxu1 %v1337_v37  ;;  %v880_v37 = vand.u32 127, %v879_v36 }
  0x47   : > { %779 = vmatpush.bf16.msrb.mxu2 %v1285_v42  ;;  %628 = vmatpush.bf16.msra.mxu3 %v1171_v47 }
  0x48   : > { %v881_v39 = vadd.s32 128, %v880_v37  ;;  %v884_v41 = vadd.s32 %v883_v38, %v880_v37 }
  0x49   : > { %804 = vmatpush.bf16.msra.mxu0 %v1297_v40  ;;  %1346 = vmatmul.msk.bf16.vlgmr.msra.gmra.mxu1 %vm413_vm0, %v670_v24  ;;  %v838_v40 = vld [vmem:[%s2014_s4] sm:$0xff] }
  0x4a   : > { %629 = vmatmul.bf16.vlgmr.msra.gmra.mxu3 %v1837_v60  ;;  %925 = vrot.lane.b32.xlu1 %v921_v35, %s1498_s11  ;;  %v885_v43 = vadd.s32 %v883_v38, %v881_v39  ;;  %vm886_vm4 = vcmp.ge.s32.totalorder %v884_v41, 16  ;;  %vm888_vm5 = vcmp.lt.s32.totalorder %v884_v41, 272 }
  0x4b   : > { %780 = vmatpush.bf16.msrb.mxu2 %v1277_v49  ;;  %vm890_vm8 = vmand %vm886_vm4, %vm888_vm5 }
  0x4c   : > { %vm887_vm6 = vcmp.ge.s32.totalorder %v885_v43, 16  ;;  %vm889_vm7 = vcmp.lt.s32.totalorder %v885_v43, 272 }
  0x4d   : > { %805 = vmatpush.bf16.msra.mxu0 %v1289_v48  ;;  %vm891_vm9 = vmand %vm887_vm6, %vm889_vm7 }
  0x4f   : > { %781 = vmatpush.bf16.msrb.mxu2 %v1269_v55 }
  0x51   : > { %806 = vmatpush.bf16.msra.mxu0 %v1281_v54 }
  0x52   : > { %782 = vmatmul.bf16.vlgmr.msrb.gmra.mxu2 %v669_v25 }
  0x55   : > { %807 = vmatpush.bf16.msra.mxu0 %v1273_v58 }
  0x58   : > { %808 = vmatmul.bf16.vlgmr.msra.gmra.mxu0 %v669_v25 }
  0x59   : > { %1347 = vmatmul.msk.bf16.vlgmr.msrb.gmra.mxu1 %vm413_vm0, %v670_v24 }
  0xa6   : > { %v438_v59 = vpop.f32.mrf.mxu1 }
  0xad   : > { %v464_v61 = vpop.f32.mrf.mxu3  ;;  %v425_v62 = vpop.f32.mrf.mxu0 }
  0xae   : > { %v440_v63 = vpop.f32.mrf.mxu1  ;;  %v439_v17 = vadd.f32 %v438_v59, %v425_v62  ;;  %v936_v59 = vld [vmem:[%s2015_s5] sm:$0xff] }
  0xb3   : > { %v924_v62 = vpop.permute.xlu1 %923 }
  0xb5   : > { %v466_v0 = vpop.f32.mrf.mxu3  ;;  %v451_v1 = vpop.f32.mrf.mxu2 }
  0xb6   : > { %v427_v3 = vpop.f32.mrf.mxu0  ;;  %v604_v4 = vpop.f32.mrf.mxu1  ;;  %v465_v24 = vadd.f32 %v464_v61, %v451_v1  ;;  %v1500_v61 = vmov 0  }
  0xb7   : > { %1457 = vset.pattern.permute.xlu0 %v1500_v61 }
  0xbc   : > { %v926_v1 = vpop.permute.xlu1 %925 }
  0xbd   : > { %v617_v5 = vpop.f32.mrf.mxu3  ;;  %v453_v60 = vpop.f32.mrf.mxu2 }
  0xbe   : > { %v643_v6 = vpop.f32.mrf.mxu0  ;;  %v606_v7 = vpop.f32.mrf.mxu1  ;;  %v618_v11 = vadd.f32 %v617_v5, %v604_v4  ;;  %v927_v5 = vsel %vm909_vm11, %v924_v62, %v926_v1 }
  0xc0   : > { %v828_v15 = vrot.slane %v618_v11, 4  ;;  %v935_v11 = vld [vmem:[%s2013_s3] sm:$0xf] }
  0xc2   : > { %v833_v20 = vsel %vm832_vm1, %v439_v17, %v828_v15 }
  0xc5   : > { %v619_v8 = vpop.f32.mrf.mxu3 }
  0xc6   : > { %v645_v9 = vpop.f32.mrf.mxu0  ;;  %v796_v10 = vpop.f32.mrf.mxu1 }
  0xcd   : > { %v630_v12 = vpop.f32.mrf.mxu3 }
  0xce   : > { %v798_v13 = vpop.f32.mrf.mxu1  ;;  %v644_v16 = vadd.f32 %v643_v6, %v630_v12 }
  0xd0   : > { %v829_v21 = vrot.slane %v644_v16, 4 }
  0xd2   : > { %v834_v30 = vsel %vm832_vm1, %v465_v24, %v829_v21 }
  0xd5   : > { %v809_v14 = vpop.f32.mrf.mxu0  ;;  %v783_v18 = vpop.f32.mrf.mxu2 }
  0xd6   : > { %v797_v19 = vadd.f32 %v796_v10, %v783_v18  ;;  %v632_v22 = vpop.f32.mrf.mxu3  ;;  %v822_v25 = vpop.f32.mrf.mxu1 }
  0xd7   : > { %v823_v28 = vadd.f32 %v822_v25, %v809_v14 }
  0xd8   : > { %v835_v23 = vpack.c.bf16 %v797_v19, %v833_v20 }
  0xd9   : > { %v836_v31 = vpack.c.bf16 %v823_v28, %v834_v30 }
  0xda   : > { %v846_v26 = vsel %vm844_vm2, %v835_v23, 0 }
  0xdb   : > { %858 = vmatpush.bf16.msrb.mxu3 %v846_v26  ;;  %v849_v2 = vsel %vm844_vm2, %v836_v31, 0 }
  0xdc   : > { %871 = vmatpush.bf16.msra.mxu2 %v849_v2 }
  0xdd   : > { %v811_v27 = vpop.f32.mrf.mxu0  ;;  %v785_v32 = vpop.f32.mrf.mxu2 }
  0xde   : > { %1348 = vmatmul.msk.bf16.vlgmr.msrb.gmra.mxu3 %vm840_vm3, %v837_v29  ;;  %v824_v33 = vpop.f32.mrf.mxu1 }
  0xdf   : > { %1349 = vmatmul.msk.bf16.vlgmr.msra.gmra.mxu2 %vm840_vm3, %v837_v29 }
 0x161   : > { %v860_v42 = vpop.f32.mrf.mxu3 }
 0x162   : > { %v861_v44 = vadd.f32 %v860_v42, %v838_v40  ;;  %v873_v47 = vpop.f32.mrf.mxu2 }
 0x163   : > { %v874_v48 = vadd.f32 %v873_v47, %v839_v45 }
 0x164   : > { %v877_v46 = vmax.f32 %v861_v44, 0.0 }
 0x165   : > { %v878_v50 = vmax.f32 %v874_v48, 0.0 }
 0x166   : > { %v896_v49 = vsel %vm890_vm8, %v877_v46, 0.0 }
 0x167   : > { %v897_v52 = vsel %vm891_vm9, %v878_v50, 0.0  ;;  %v898_v9 = vpack.c.bf16 %v896_v49, %v896_v49 }
 0x168   : > { %v899_v53 = vpack.c.bf16 %v897_v52, %v896_v49 }
 0x169   : > { %v862_v51 = vpop.f32.mrf.mxu3 }
 0x16a   : > { %v875_v54 = vpop.f32.mrf.mxu2  ;;  %v901_v55 = vunpack.c.l.b16 %v899_v53  ;;  %v902_v57 = vunpack.c.h.b16 %v899_v53 }
 0x16c   : > { %v903_v56 = vpack.c.b16 %v901_v55, %v901_v55  ;;  %v904_v58 = vpack.c.b16 %v902_v57, %v902_v57 }
 0x16e   : > { %905 = vrot.lane.b32.xlu2 %v903_v56, %s1498_s11  ;;  %911 = vrot.lane.b32.xlu0 %v903_v56, %s1499_s21 }
 0x176   : > { %907 = vrot.lane.b32.xlu2 %v904_v58, %s1498_s11  ;;  %913 = vrot.lane.b32.xlu0 %v904_v58, %s1499_s21 }
 0x17e   : > { %939 = vperm.xlu0 %1457, %v936_v59  }
 0x1c8   : > { %v906_v63 = vpop.permute.xlu2 %905 }
 0x1d0   : > { %v908_v4 = vpop.permute.xlu2 %907 }
 0x1d1   : > { %v910_v8 = vsel %vm909_vm11, %v906_v63, %v908_v4 }
 0x1d2   : > { %v930_v10 = vsel %vm832_vm1, %v898_v9, %v910_v8 }
 0x1e0   : > { %v912_v0 = vpop.permute.xlu0 %911 }
 0x1e8   : > { %v914_v3 = vpop.permute.xlu0 %913 }
 0x1e9   : > { %v916_v60 = vsel %vm915_vm10, %v912_v0, %v914_v3 }
 0x1ea   : > { %v934_v6 = vsel %vm832_vm1, %v916_v60, %v927_v5 }
 0x1eb   : > { %v946_v7 = vsel %vm844_vm2, %v934_v6, 0 }
 0x1ec   : > { %954 = vmatpush.bf16.msra.mxu1 %v946_v7 }
 0x1f0   : > { %955 = vmatpush.bf16.msra.mxu1 %v930_v10  ;;  %v940_v12 = vpop.permute.xlu0 %939 }
 0x1f3   : > { %1351 = vmatmul.msk.bf16.vlgmr.msra.gmra.mxu1 %vm942_vm12, %v935_v11 }
 0x270   : > { %v957_v13 = vpop.f32.mrf.mxu1 }
 0x271   : > { %v958_v14 = vadd.f32 %v957_v13, %v940_v12 }
 0x273   : > { %v961_v15 = vmax.f32 %v958_v14, 0.0 }
 0x275   : > { %962 = vst [vmem:[%s285_s10] sm:$0xff] %v961_v15 }
 0x278   : > { %v959_v16 = vpop.f32.mrf.mxu1 }
 0x279 PF: > { %s16_s25 = sadd.s32 1, %s1496_s25   ;;  %s2017_s21 = smov %s1488_s23 }
 0x27a   : > { %p13_p7 = scmp.ge.s32.totalorder %s16_s25, 6   ;;  %s2018_s22 = smov %s1492_s24 }
 0x27b   : > { %s2019_s23 = smov %s2022_s26  ;;  %s2020_s24 = smov %s2026_s27 }
 0x27c   :  { %15 = sbr.rel (!%p13_p7) target bundleno = 3 (0x3), region = 77 }

</bundles_post_ra>
